<compile_context>
chip_gen: v6e
topology: v6e:2x2x1
jax: 0.10.0
libtpu: 0.0.40
codegen_flags: <defaults>
</compile_context>

<pallas_src>
import functools

import jax
import jax.numpy as jnp
from jax.experimental import pallas as pl
from jax.experimental.pallas import tpu as pltpu


def _round_up(x, m):
    return ((x + m - 1) // m) * m


# ----------------------------------------------------------------------------
# Fused kernel: folded 2-layer MLP for all components + softplus/softmax
# ----------------------------------------------------------------------------
def _fused_gmm_head_kernel(std_min, dyc, z_ref, w1_ref, b1_ref, w2_ref, b2_ref,
                           mean_ref, std_ref, wgt_ref):
    # Layer 1: all C components in one [TN, E] @ [E, C*F] matmul.
    z = z_ref[...]                                                  # [TN, E]
    h = jnp.dot(z, w1_ref[...], preferred_element_type=jnp.float32)
    h = jnp.maximum(h + b1_ref[...], 0.0)                           # [TN, C*F]

    # Layer 2: block-diagonal [C*F, 3*dy*C] with columns pre-permuted to the
    # o*C + c interleave of torch.stack(...).movedim(0,-1).flatten(-2,-1).
    out = jnp.dot(h, w2_ref[...], preferred_element_type=jnp.float32)
    out = out + b2_ref[...]                                         # [TN, 3*dy*C]

    raw_mean = out[:, 0:dyc]
    raw_std = out[:, dyc:2 * dyc]
    raw_w = out[:, 2 * dyc:3 * dyc]

    # mean = raw_mean (passthrough)
    mean_ref[...] = raw_mean

    # std = softplus(raw_std) + std_min  (PyTorch softplus threshold=20).
    sp = jnp.where(raw_std > 20.0, raw_std,
                   jnp.log1p(jnp.exp(jnp.minimum(raw_std, 20.0))))
    std_ref[...] = sp + std_min

    # weights = softmax(raw_w, axis=-1)
    m = jnp.max(raw_w, axis=-1, keepdims=True)
    e = jnp.exp(raw_w - m)
    wgt_ref[...] = e * pl.reciprocal(jnp.sum(e, axis=-1, keepdims=True))


# ----------------------------------------------------------------------------
# Wrapper reproducing GMMTargetHead.forward (single_head=False)
# ----------------------------------------------------------------------------
def gmm_target_head_forward(z_target, params, dim_y, num_components,
                            std_min=1e-4, tile_n=512):
    B, T, E = z_target.shape
    C = num_components
    F = params["w1"].shape[-1]
    OD = 3 * dim_y          # per-component head output width
    DYC = dim_y * C         # width of each final output (mean/std/weights)
    N = B * T
    f32 = jnp.float32

    # ---- Fold per-component weights into single wide matmul operands -------
    # W1_all[e, c*F + f] = w1[c, e, f]
    w1_all = jnp.transpose(params["w1"], (1, 0, 2)).reshape(E, C * F).astype(f32)
    # b1_all[0, c*F + f] = b1[c, 0, f]
    b1_all = params["b1"][:, 0, :].reshape(1, C * F).astype(f32)
    # W2_perm[c*F + f, o*C + d] = w2[c, f, o] if d == c else 0  (block diagonal,
    # columns already in the stack/movedim/flatten interleave).
    eye_c = jnp.eye(C, dtype=f32)
    w2_perm = (params["w2"].astype(f32)[:, :, :, None]
               * eye_c[:, None, None, :]).reshape(C * F, OD * C)
    # b2_perm[0, o*C + c] = b2[c, 0, o]
    b2_perm = jnp.transpose(params["b2"][:, 0, :], (1, 0)).reshape(1, OD * C)
    b2_perm = b2_perm.astype(f32)

    # ---- Tile over rows (parallel grid axis); pad the ragged tail ----------
    z_flat = z_target.reshape(N, E).astype(f32)
    tn = min(tile_n, _round_up(N, 8))      # tile rows, multiple of 8 (f32)
    n_pad = _round_up(N, tn)
    if n_pad != N:
        z_flat = jnp.pad(z_flat, ((0, n_pad - N), (0, 0)))
    grid = (n_pad // tn,)

    out_sds = jax.ShapeDtypeStruct((n_pad, DYC), f32)
    out_spec = pl.BlockSpec((tn, DYC), lambda i: (i, 0))

    mean, std, weights = pl.pallas_call(
        functools.partial(_fused_gmm_head_kernel, float(std_min), DYC),
        out_shape=(out_sds, out_sds, out_sds),
        grid_spec=pltpu.PrefetchScalarGridSpec(
            num_scalar_prefetch=0,
            grid=grid,
            in_specs=[
                pl.BlockSpec((tn, E), lambda i: (i, 0)),          # z tile
                pl.BlockSpec((E, C * F), lambda i: (0, 0)),       # W1_all
                pl.BlockSpec((1, C * F), lambda i: (0, 0)),       # b1_all
                pl.BlockSpec((C * F, OD * C), lambda i: (0, 0)),  # W2_perm
                pl.BlockSpec((1, OD * C), lambda i: (0, 0)),      # b2_perm
            ],
            out_specs=(out_spec, out_spec, out_spec),
        ),
        compiler_params=pltpu.CompilerParams(
            dimension_semantics=("parallel",)),
    )(z_flat, w1_all, b1_all, w2_perm, b2_perm)

    out_shape = (B, T, DYC)
    return {
        "mixture_means": mean[:N].reshape(out_shape),
        "mixture_stds": std[:N].reshape(out_shape),
        "mixture_weights": weights[:N].reshape(out_shape),
    }


# ----------------------------------------------------------------------------
# Pure-JAX reference for verification (faithful to the PyTorch module)
# ----------------------------------------------------------------------------
def reference_forward(z_target, params, dim_y, num_components, std_min=1e-4):
    outs = []
    for c in range(num_components):
        h = jnp.maximum(z_target @ params["w1"][c] + params["b1"][c, 0], 0.0)
        outs.append(h @ params["w2"][c] + params["b2"][c, 0])
    concat = jnp.stack(outs, axis=-1)                        # [..., 3*dy, C]
    concat = concat.reshape(*concat.shape[:-2], -1)          # [..., 3*dy*C]
    rm, rs, rw = jnp.split(concat, 3, axis=-1)
    std = jnp.where(rs > 20.0, rs,
                    jnp.log1p(jnp.exp(jnp.minimum(rs, 20.0)))) + std_min
    weights = jax.nn.softmax(rw, axis=-1)
    return {"mixture_means": rm, "mixture_stds": std, "mixture_weights": weights}


if __name__ == "__main__":
    dim_embedding = 32
    dim_feedforward = 64
    dim_y = 2
    num_components = 3
    std_min = 1e-4

    key = jax.random.PRNGKey(0)
    k_z, k_w1, k_b1, k_w2, k_b2, k_z2 = jax.random.split(key, 6)

    params = {
        "w1": 0.05 * jax.random.normal(
            k_w1, (num_components, dim_embedding, dim_feedforward), jnp.float32),
        "b1": 0.01 * jax.random.normal(
            k_b1, (num_components, 1, dim_feedforward), jnp.float32),
        "w2": 0.05 * jax.random.normal(
            k_w2, (num_components, dim_feedforward, 3 * dim_y), jnp.float32),
        "b2": 0.01 * jax.random.normal(
            k_b2, (num_components, 1, 3 * dim_y), jnp.float32),
    }

    # --- Test 1: small shapes, single tile -----------------------------------
    B, T = 2, 8
    z_target = jax.random.normal(k_z, (B, T, dim_embedding), jnp.float32)
    outs = gmm_target_head_forward(z_target, params, dim_y, num_components,
                                   std_min)
    jax.block_until_ready(outs)
    ref = reference_forward(z_target, params, dim_y, num_components, std_min)
    for name in ("mixture_means", "mixture_stds", "mixture_weights"):
        assert outs[name].shape == (B, T, dim_y * num_components), name
        assert jnp.allclose(outs[name], ref[name], atol=1e-5, rtol=1e-5), name

    # --- Test 2: multi-tile grid with ragged tail (padding path) -------------
    B2, T2 = 2, 600                       # N = 1200 -> 3 tiles of 512 (padded)
    z_target2 = jax.random.normal(k_z2, (B2, T2, dim_embedding), jnp.float32)
    outs2 = gmm_target_head_forward(z_target2, params, dim_y, num_components,
                                    std_min)
    jax.block_until_ready(outs2)
    ref2 = reference_forward(z_target2, params, dim_y, num_components, std_min)
    for name in ("mixture_means", "mixture_stds", "mixture_weights"):
        assert outs2[name].shape == (B2, T2, dim_y * num_components), name
        assert jnp.allclose(outs2[name], ref2[name], atol=1e-5, rtol=1e-5), name

    print("KERNEL_OK")
</pallas_src>

<mosaic_0001>
module attributes {stable_mosaic.version = 11 : i64} {
  func.func @_fused_gmm_head_kernel(%arg0: i32, %arg1: memref<16x32xf32, #tpu.memory_space<vmem>>, %arg2: memref<32x192xf32, #tpu.memory_space<vmem>>, %arg3: memref<1x192xf32, #tpu.memory_space<vmem>>, %arg4: memref<192x18xf32, #tpu.memory_space<vmem>>, %arg5: memref<1x18xf32, #tpu.memory_space<vmem>>, %arg6: memref<16x6xf32, #tpu.memory_space<vmem>>, %arg7: memref<16x6xf32, #tpu.memory_space<vmem>>, %arg8: memref<16x6xf32, #tpu.memory_space<vmem>>) attributes {dimension_semantics = [#tpu.dimension_semantics<parallel>], iteration_bounds = array<i64: 1>, scalar_prefetch = 0 : i64, scratch_operands = 0 : i64, tpu.core_type = #tpu.core_type<tc>, window_params = [{transform_indices = @transform_0, window_bounds = array<i64: 16, 32>}, {pipeline_mode = #tpu.pipeline_mode<synchronous>, transform_indices = @transform_1, window_bounds = array<i64: 32, 192>}, {pipeline_mode = #tpu.pipeline_mode<synchronous>, transform_indices = @transform_2, window_bounds = array<i64: 1, 192>}, {pipeline_mode = #tpu.pipeline_mode<synchronous>, transform_indices = @transform_3, window_bounds = array<i64: 192, 18>}, {pipeline_mode = #tpu.pipeline_mode<synchronous>, transform_indices = @transform_4, window_bounds = array<i64: 1, 18>}, {transform_indices = @transform_5, window_bounds = array<i64: 16, 6>}, {transform_indices = @transform_6, window_bounds = array<i64: 16, 6>}, {transform_indices = @transform_7, window_bounds = array<i64: 16, 6>}]} {
    %c0 = arith.constant 0 : index
    %c0_0 = arith.constant 0 : index
    %0 = vector.load %arg1[%c0, %c0_0] : memref<16x32xf32, #tpu.memory_space<vmem>>, vector<16x32xf32>
    %c0_1 = arith.constant 0 : index
    %c0_2 = arith.constant 0 : index
    %1 = vector.load %arg2[%c0_1, %c0_2] : memref<32x192xf32, #tpu.memory_space<vmem>>, vector<32x192xf32>
    %cst = arith.constant dense<0.000000e+00> : vector<16x192xf32>
    %2 = tpu.matmul %0, %1, %cst {dimension_numbers = #tpu.dot_dimension_numbers<[1], [0], [0], [1], [0, 0, 1, 1], [], []>} : vector<16x32xf32>, vector<32x192xf32>, vector<16x192xf32> -> vector<16x192xf32>
    %c0_3 = arith.constant 0 : index
    %c0_4 = arith.constant 0 : index
    %3 = vector.load %arg3[%c0_3, %c0_4] : memref<1x192xf32, #tpu.memory_space<vmem>>, vector<1x192xf32>
    %4 = vector.broadcast %3 : vector<1x192xf32> to vector<16x192xf32>
    %5 = arith.addf %2, %4 : vector<16x192xf32>
    %cst_5 = arith.constant 0.000000e+00 : f32
    %6 = vector.broadcast %cst_5 : f32 to vector<16x192xf32>
    %7 = arith.maximumf %5, %6 : vector<16x192xf32>
    %c0_6 = arith.constant 0 : index
    %c0_7 = arith.constant 0 : index
    %8 = vector.load %arg4[%c0_6, %c0_7] : memref<192x18xf32, #tpu.memory_space<vmem>>, vector<192x18xf32>
    %cst_8 = arith.constant dense<0.000000e+00> : vector<16x18xf32>
    %9 = tpu.matmul %7, %8, %cst_8 {dimension_numbers = #tpu.dot_dimension_numbers<[1], [0], [0], [1], [0, 0, 1, 1], [], []>} : vector<16x192xf32>, vector<192x18xf32>, vector<16x18xf32> -> vector<16x18xf32>
    %c0_9 = arith.constant 0 : index
    %c0_10 = arith.constant 0 : index
    %10 = vector.load %arg5[%c0_9, %c0_10] : memref<1x18xf32, #tpu.memory_space<vmem>>, vector<1x18xf32>
    %11 = vector.broadcast %10 : vector<1x18xf32> to vector<16x18xf32>
    %12 = arith.addf %9, %11 : vector<16x18xf32>
    %13 = vector.extract_strided_slice %12 {offsets = [0, 0], sizes = [16, 6], strides = [1, 1]} : vector<16x18xf32> to vector<16x6xf32>
    %14 = vector.extract_strided_slice %12 {offsets = [0, 6], sizes = [16, 6], strides = [1, 1]} : vector<16x18xf32> to vector<16x6xf32>
    %15 = vector.extract_strided_slice %12 {offsets = [0, 12], sizes = [16, 6], strides = [1, 1]} : vector<16x18xf32> to vector<16x6xf32>
    %c0_11 = arith.constant 0 : index
    %c0_12 = arith.constant 0 : index
    %16 = vector.load %arg6[%c0_11, %c0_12] : memref<16x6xf32, #tpu.memory_space<vmem>>, vector<16x6xf32>
    tpu.vector_store %arg6[%c0_11, %c0_12], %13 {strides = array<i32>} : memref<16x6xf32, #tpu.memory_space<vmem>>, vector<16x6xf32>,
    %cst_13 = arith.constant 2.000000e+01 : f32
    %17 = vector.broadcast %cst_13 : f32 to vector<16x6xf32>
    %18 = arith.cmpf ogt, %14, %17 : vector<16x6xf32>
    %cst_14 = arith.constant 2.000000e+01 : f32
    %19 = vector.broadcast %cst_14 : f32 to vector<16x6xf32>
    %20 = arith.minimumf %14, %19 : vector<16x6xf32>
    %21 = math.exp %20 : vector<16x6xf32>
    %22 = math.log1p %21 : vector<16x6xf32>
    %23 = arith.select %18, %14, %22 : vector<16x6xi1>, vector<16x6xf32>
    %cst_15 = arith.constant 9.99999974E-5 : f32
    %24 = vector.broadcast %cst_15 : f32 to vector<16x6xf32>
    %25 = arith.addf %23, %24 : vector<16x6xf32>
    %c0_16 = arith.constant 0 : index
    %c0_17 = arith.constant 0 : index
    %26 = vector.load %arg7[%c0_16, %c0_17] : memref<16x6xf32, #tpu.memory_space<vmem>>, vector<16x6xf32>
    tpu.vector_store %arg7[%c0_16, %c0_17], %25 {strides = array<i32>} : memref<16x6xf32, #tpu.memory_space<vmem>>, vector<16x6xf32>,
    %cst_18 = arith.constant dense<0xFF800000> : vector<16xf32>
    %27 = vector.multi_reduction <maximumf>, %15, %cst_18 [1] : vector<16x6xf32> to vector<16xf32>
    %28 = vector.shape_cast %27 : vector<16xf32> to vector<16x1xf32>
    %29 = vector.broadcast %28 : vector<16x1xf32> to vector<16x6xf32>
    %30 = arith.subf %15, %29 : vector<16x6xf32>
    %31 = math.exp %30 : vector<16x6xf32>
    %cst_19 = arith.constant dense<0.000000e+00> : vector<16xf32>
    %32 = vector.multi_reduction <add>, %31, %cst_19 [1] : vector<16x6xf32> to vector<16xf32>
    %33 = vector.shape_cast %32 : vector<16xf32> to vector<16x1xf32>
    %34 = tpu.reciprocal %33 : vector<16x1xf32> -> vector<16x1xf32>
    %35 = vector.broadcast %34 : vector<16x1xf32> to vector<16x6xf32>
    %36 = arith.mulf %31, %35 : vector<16x6xf32>
    %c0_20 = arith.constant 0 : index
    %c0_21 = arith.constant 0 : index
    %37 = vector.load %arg8[%c0_20, %c0_21] : memref<16x6xf32, #tpu.memory_space<vmem>>, vector<16x6xf32>
    tpu.vector_store %arg8[%c0_20, %c0_21], %36 {strides = array<i32>} : memref<16x6xf32, #tpu.memory_space<vmem>>, vector<16x6xf32>,
    return
  }
  func.func @transform_0(%arg0: i32) -> (i32, i32) {
    %c0_i32 = arith.constant 0 : i32
    %c0_i32_0 = arith.constant 0 : i32
    return %arg0, %c0_i32 : i32, i32
  }
  func.func @transform_1(%arg0: i32) -> (i32, i32) {
    %c0_i32 = arith.constant 0 : i32
    %c0_i32_0 = arith.constant 0 : i32
    %c0_i32_1 = arith.constant 0 : i32
    return %c0_i32, %c0_i32_0 : i32, i32
  }
  func.func @transform_2(%arg0: i32) -> (i32, i32) {
    %c0_i32 = arith.constant 0 : i32
    %c0_i32_0 = arith.constant 0 : i32
    %c0_i32_1 = arith.constant 0 : i32
    return %c0_i32, %c0_i32_0 : i32, i32
  }
  func.func @transform_3(%arg0: i32) -> (i32, i32) {
    %c0_i32 = arith.constant 0 : i32
    %c0_i32_0 = arith.constant 0 : i32
    %c0_i32_1 = arith.constant 0 : i32
    return %c0_i32, %c0_i32_0 : i32, i32
  }
  func.func @transform_4(%arg0: i32) -> (i32, i32) {
    %c0_i32 = arith.constant 0 : i32
    %c0_i32_0 = arith.constant 0 : i32
    %c0_i32_1 = arith.constant 0 : i32
    return %c0_i32, %c0_i32_0 : i32, i32
  }
  func.func @transform_5(%arg0: i32) -> (i32, i32) {
    %c0_i32 = arith.constant 0 : i32
    %c0_i32_0 = arith.constant 0 : i32
    return %arg0, %c0_i32 : i32, i32
  }
  func.func @transform_6(%arg0: i32) -> (i32, i32) {
    %c0_i32 = arith.constant 0 : i32
    %c0_i32_0 = arith.constant 0 : i32
    return %arg0, %c0_i32 : i32, i32
  }
  func.func @transform_7(%arg0: i32) -> (i32, i32) {
    %c0_i32 = arith.constant 0 : i32
    %c0_i32_0 = arith.constant 0 : i32
    return %arg0, %c0_i32 : i32, i32
  }
}

</mosaic_0001>

<bundles_post_ra>
// kernel: tpu_custom_call.1
= control target key start
LH: loop header
LB: loop body
LE: loop exit
PB: predicated region body
PF: predicated region fallthrough
CT: control target
= control target key end

     0   :  { %v366_v3 = vmov 0.0   ;;  %vm45_vm0 = vcmask 261120   ;;  %v35_v35 = vlaneseq  ;;  %vm164_vm1 = vcmask 523264   ;;  %s575_s1 = inlined_call_operand.vmem [shape: f32[32,192], index: 1, kind: input, shape index: {}]   ;;  %s576_s3 = inlined_call_operand.vmem [shape: f32[192,18], index: 3, kind: input, shape index: {}]   ;;  %s577_s0 = inlined_call_operand.vmem [shape: f32[16,32], index: 0, kind: input, shape index: {}]   ;;  %s578_s2 = inlined_call_operand.vmem [shape: f32[1,192], index: 2, kind: input, shape index: {}]   ;;  %s579_s4 = inlined_call_operand.vmem [shape: f32[1,18], index: 4, kind: input, shape index: {}]   ;;  %s580_s5 = inlined_call_operand.vmem [shape: f32[16,6], index: 5, kind: output, shape index: {0}]   ;;  %s581_s6 = inlined_call_operand.vmem [shape: f32[16,6], index: 6, kind: output, shape index: {1}]   ;;  %s582_s7 = inlined_call_operand.vmem [shape: f32[16,6], index: 7, kind: output, shape index: {2}]  }
   0x1   :  { %v32_v0 = vld [vmem:[%s575_s1 + $0x38] sm:$0xff]  ;;  %v31_v1 = vld [vmem:[%s575_s1 + $0x30] sm:$0xff]  ;;  %v30_v2 = vld [vmem:[%s575_s1 + $0x28] sm:$0xff]  ;;  %116 = vmatprep.mubr.f32.mxu0 %v366_v3  ;;  %171 = vmatprep.subr.mxu1 %v366_v3  ;;  %vm289_vm2 = vcmask 146528   ;;  %vm246_vm3 = vcmask 48128  }
   0x2   :  { %76 = vmatprep.subr.mxu0 %v32_v0  ;;  %v29_v4 = vld [vmem:[%s575_s1 + $0x20] sm:$0xff]  ;;  %v28_v5 = vld [vmem:[%s575_s1 + $0x18] sm:$0xff]  ;;  %v27_v6 = vld [vmem:[%s575_s1 + $0x10] sm:$0xff]  ;;  %v36_v36 = vshrl.u32 %v35_v35, 7 }
   0x3   :  { %77 = vmatpush1.msra.mxu0 %v31_v1  ;;  %v148_v7 = vld [vmem:[%s576_s3 + $0x78] sm:$0xff]  ;;  %v147_v8 = vld [vmem:[%s576_s3 + $0x70] sm:$0xff]  ;;  %v26_v9 = vld [vmem:[%s575_s1 + $0x8] sm:$0xff] }
   0x4   :  { %78 = vmatprep.subr.mxu0 %v30_v2  ;;  %172 = vmatpush1.msra.mxu1 %v148_v7  ;;  %v25_v10 = vld [vmem:[%s575_s1] sm:$0xff]  ;;  %v146_v11 = vld [vmem:[%s576_s3 + $0x68] sm:$0xff]  ;;  %v144_v14 = vld [vmem:[%s576_s3 + $0x58] sm:$0xff]  ;;  %v37_v37 = vsub.s32 0, %v36_v36  ;;  %v41_v39 = vsub.s32 1, %v36_v36 }
   0x5   :  { %79 = vmatpush1.msra.mxu0 %v29_v4  ;;  %173 = vmatprep.subr.mxu1 %v366_v3  ;;  %v23_v12 = vld [vmem:[%s577_s0] sm:$0xff]  ;;  %v24_v15 = vld [vmem:[%s577_s0 + $0x8] sm:$0xff]  ;;  %v143_v16 = vld [vmem:[%s576_s3 + $0x50] sm:$0xff] }
   0x6   :  { %80 = vmatprep.subr.mxu0 %v28_v5  ;;  %174 = vmatpush1.msra.mxu1 %v147_v8  ;;  %v145_v13 = vld [vmem:[%s576_s3 + $0x60] sm:$0xff]  ;;  %v142_v17 = vld [vmem:[%s576_s3 + $0x48] sm:$0xff]  ;;  %v140_v19 = vld [vmem:[%s576_s3 + $0x38] sm:$0xff] }
   0x7   :  { %81 = vmatpush1.msra.mxu0 %v27_v6  ;;  %175 = vmatprep.subr.mxu1 %v366_v3  ;;  %v141_v18 = vld [vmem:[%s576_s3 + $0x40] sm:$0xff]  ;;  %v139_v20 = vld [vmem:[%s576_s3 + $0x30] sm:$0xff]  ;;  %v138_v21 = vld [vmem:[%s576_s3 + $0x28] sm:$0xff] }
   0x8   :  { %82 = vmatprep.subr.mxu0 %v26_v9  ;;  %176 = vmatpush1.msra.mxu1 %v146_v11  ;;  %v137_v22 = vld [vmem:[%s576_s3 + $0x20] sm:$0xff]  ;;  %v136_v23 = vld [vmem:[%s576_s3 + $0x18] sm:$0xff]  ;;  %v135_v24 = vld [vmem:[%s576_s3 + $0x10] sm:$0xff] }
   0x9   :  { %83 = vmatpush1.msra.mxu0 %v25_v10  ;;  %177 = vmatprep.subr.mxu1 %v366_v3  ;;  %v134_v25 = vld [vmem:[%s576_s3 + $0x8] sm:$0xff]  ;;  %v133_v26 = vld [vmem:[%s576_s3] sm:$0xff]  ;;  %v156_v27 = vld [vmem:[%s576_s3 + $0xb8] sm:$0xff] }
   0xa   :  { %342 = vmatmul.mubr.msk.f32.vlgmr.msra.gmra.mxu0 %vm45_vm0, %v23_v12  ;;  %178 = vmatpush1.msra.mxu1 %v145_v13  ;;  %v155_v28 = vld [vmem:[%s576_s3 + $0xb0] sm:$0xff]  ;;  %v154_v29 = vld [vmem:[%s576_s3 + $0xa8] sm:$0xff]  ;;  %v153_v30 = vld [vmem:[%s576_s3 + $0xa0] sm:$0xff] }
   0xb   :  { %122 = vmatprep.mubr.f32.mxu0 %v366_v3  ;;  %179 = vmatprep.subr.mxu1 %v366_v3  ;;  %v152_v31 = vld [vmem:[%s576_s3 + $0x98] sm:$0xff]  ;;  %v151_v32 = vld [vmem:[%s576_s3 + $0x90] sm:$0xff]  ;;  %v150_v33 = vld [vmem:[%s576_s3 + $0x88] sm:$0xff] }
   0xc   :  { %180 = vmatpush1.msra.mxu1 %v144_v14  ;;  %v149_v34 = vld [vmem:[%s576_s3 + $0x80] sm:$0xff] }
   0xd   :  { %181 = vmatprep.subr.mxu1 %v366_v3  ;;  %v33_v38 = vld [vmem:[%s578_s2] sm:$0x3] }
   0xe   :  { %343 = vmatmul.mubr.msk.f32.gmra.mxu0 %vm45_vm0, %v24_v15  ;;  %182 = vmatpush1.msra.mxu1 %v143_v16  ;;  %v38_v40 = vrot.slane %v33_v38, %v37_v37  ;;  %v42_v41 = vrot.slane %v33_v38, %v41_v39  ;;  %v344_v54 = vld [vmem:[%s579_s4] ss:$0 sm:$0xff]  ;;  %s367_s4 = smov 116  }
   0xf   :  { %183 = vmatprep.subr.mxu1 %v366_v3 }
  0x10   :  { %184 = vmatpush1.msra.mxu1 %v142_v17 }
  0x11   :  { %185 = vmatprep.subr.mxu1 %v366_v3 }
  0x12   :  { %186 = vmatpush1.msra.mxu1 %v141_v18 }
  0x13   :  { %187 = vmatprep.subr.mxu1 %v366_v3 }
  0x14   :  { %188 = vmatpush1.msra.mxu1 %v140_v19 }
  0x15   :  { %189 = vmatprep.subr.mxu1 %v366_v3 }
  0x16   :  { %190 = vmatpush1.msra.mxu1 %v139_v20 }
  0x17   :  { %191 = vmatprep.subr.mxu1 %v366_v3 }
  0x18   :  { %192 = vmatpush1.msra.mxu1 %v138_v21 }
  0x19   :  { %193 = vmatprep.subr.mxu1 %v366_v3 }
  0x1a   :  { %194 = vmatpush1.msra.mxu1 %v137_v22 }
  0x1b   :  { %195 = vmatprep.subr.mxu1 %v366_v3 }
  0x1c   :  { %196 = vmatpush1.msra.mxu1 %v136_v23 }
  0x1d   :  { %197 = vmatprep.subr.mxu1 %v366_v3 }
  0x1e   :  { %198 = vmatpush1.msra.mxu1 %v135_v24 }
  0x1f   :  { %199 = vmatprep.subr.mxu1 %v366_v3 }
  0x20   :  { %200 = vmatpush1.msra.mxu1 %v134_v25 }
  0x21   :  { %201 = vmatprep.subr.mxu1 %v366_v3 }
  0x22   :  { %202 = vmatpush1.msra.mxu1 %v133_v26 }
  0x23   :  { %219 = vmatprep.subr.mxu1 %v366_v3 }
  0x24   :  { %220 = vmatpush2.msra.mxu1 %v156_v27 }
  0x25   :  { %221 = vmatprep.subr.mxu1 %v366_v3 }
  0x26   :  { %222 = vmatpush2.msra.mxu1 %v155_v28 }
  0x27   :  { %223 = vmatprep.subr.mxu1 %v366_v3 }
  0x28   :  { %224 = vmatpush2.msra.mxu1 %v154_v29 }
  0x29   :  { %225 = vmatprep.subr.mxu1 %v366_v3 }
  0x2a   :  { %226 = vmatpush2.msra.mxu1 %v153_v30 }
  0x2b   :  { %227 = vmatprep.subr.mxu1 %v366_v3 }
  0x2c   :  { %228 = vmatpush2.msra.mxu1 %v152_v31 }
  0x2d   :  { %229 = vmatprep.subr.mxu1 %v366_v3 }
  0x2e   :  { %230 = vmatpush2.msra.mxu1 %v151_v32 }
  0x2f   :  { %231 = vmatprep.subr.mxu1 %v366_v3 }
  0x30   :  { %232 = vmatpush2.msra.mxu1 %v150_v33 }
  0x31   :  { %233 = vmatprep.subr.mxu1 %v366_v3 }
  0x32   :  { %234 = vmatpush2.msra.mxu1 %v149_v34 }
  0xca   :  { %v118_v42 = vpop.f32.mrf.mxu0 }
  0xcb   :  { %v119_v43 = vadd.f32 %v118_v42, %v38_v40 }
  0xcc   :  { %v120_v44 = vpop.f32.mrf.mxu0 }
  0xcd   :  { %v121_v45 = vadd.f32 %v120_v44, %v42_v41  ;;  %v129_v48 = vmax.f32 %v119_v43, 0.0 }
  0xce   :  { %v124_v46 = vpop.f32.mrf.mxu0 }
  0xcf   :  { %v130_v47 = vmax.f32 %v121_v45, 0.0  ;;  %v125_v49 = vadd.f32 %v124_v46, %v38_v40 }
  0xd0   :  { %v126_v50 = vpop.f32.mrf.mxu0 }
  0xd1   :  { %v127_v51 = vadd.f32 %v126_v50, %v42_v41  ;;  %345 = vmatprep.mubr.msk.f32.mxu1 %vm164_vm1, %v130_v47  ;;  %v131_v53 = vmax.f32 %v125_v49, 0.0 }
  0xd2   :  { %236 = vmatmul.mubr.f32.vlgmr.msra.gmra.mxu1 %v129_v48 }
  0xd3   :  { %v132_v52 = vmax.f32 %v127_v51, 0.0 }
  0xd5   :  { %346 = vmatprep.mubr.msk.f32.mxu1 %vm164_vm1, %v132_v52 }
  0xd6   :  { %241 = vmatmul.mubr.f32.gmra.mxu1 %v131_v53 }
 0x192   :  { %v237_v55 = vpop.f32.mrf.mxu1 }
 0x193   :  { %v238_v56 = vadd.f32 %v344_v54, %v237_v55 }
 0x194   :  { %v239_v57 = vpop.f32.mrf.mxu1 }
 0x195   :  { %v290_v58 = vsel %vm289_vm2, %v238_v56, -inf  ;;  %247 = vst.msk [vmem:[%s580_s5] sm:$0xff] %vm246_vm3, %v238_v56  ;;  %v251_v7 = vmin.f32 %v238_v56, 20.0  ;;  %vm249_vm5 = vcmp.gt.f32.partialorder %v238_v56, 20.0 }
 0x196   :  { %v242_v59 = vpop.f32.mrf.mxu1  ;;  %291 = vmax.xlane.f32.xlu0 %v290_v58 }
 0x197   :  { %v243_v60 = vadd.f32 %v344_v54, %v242_v59  ;;  %v253_v8 = vmul.f32 1.442695, %v251_v7 }
 0x198   :  { %v244_v61 = vpop.f32.mrf.mxu1 }
 0x199   :  { %v293_v62 = vsel %vm289_vm2, %v243_v60, -inf  ;;  %248 = vst.msk [vmem:[%s580_s5 + $0x8] sm:$0xff] %vm246_vm3, %v243_v60  ;;  %v252_v9 = vmin.f32 %v243_v60, 20.0  ;;  %vm250_vm7 = vcmp.gt.f32.partialorder %v243_v60, 20.0  ;;  %s368_s5 = smov 122  }
 0x19a   :  { %294 = vmax.xlane.f32.xlu0 %v293_v62 }
 0x19b   :  { %v255_v10 = vmul.f32 1.442695, %v252_v9 }
 0x21f   :  { %v292_v63 = vpop.xlane.xlu0 %291 }
 0x220   :  { %v296_v0 = vsub.f32 %v238_v56, %v292_v63 }
 0x222   :  { %v298_v1 = vmul.f32 1.442695, %v296_v0 }
 0x223   :  { %v295_v2 = vpop.xlane.xlu0 %294 }
 0x224   :  { %350 = vpow2.f32 %v298_v1  ;;  %v297_v3 = vsub.f32 %v243_v60, %v295_v2 }
 0x226   :  { %v300_v4 = vmul.f32 1.442695, %v297_v3 }
 0x228   :  { %352 = vpow2.f32 %v300_v4 }
 0x229   :  { %354 = vpow2.f32 %v253_v8 }
 0x22a   :  { %356 = vpow2.f32 %v255_v10 }
 0x231   :  { %v351_v5 = vpop.eup %350 }
 0x232   :  { %304 = vrot.lane.b32.xlu1 %v351_v5, %s367_s4 }
 0x235   :  { %v353_v6 = vpop.eup %352 }
 0x236   :  { %306 = vrot.lane.b32.xlu1 %v353_v6, %s367_s4  ;;  %v355_v11 = vpop.eup %354 }
 0x237   :  { %v257_v12 = vadd.f32 1.0, %v355_v11  ;;  %v357_v13 = vpop.eup %356  ;;  %v260_v19 = vmul.f32 -0.5, %v355_v11  ;;  %v263_v23 = vand.u32 2147483647, %v355_v11 }
 0x238   :  { %v266_v14 = vadd.f32 1.0, %v357_v13  ;;  %v269_v22 = vmul.f32 -0.5, %v357_v13  ;;  %v272_v28 = vand.u32 2147483647, %v357_v13 }
 0x239   :  { %358 = vlog2.f32 %v257_v12  ;;  %v261_v21 = vadd.f32 1.0, %v260_v19  ;;  %vm264_vm4 = vcmp.lt.f32.partialorder %v263_v23, 0.0004427343 }
 0x23a   :  { %360 = vlog2.f32 %v266_v14  ;;  %v270_v27 = vadd.f32 1.0, %v269_v22  ;;  %vm273_vm6 = vcmp.lt.f32.partialorder %v272_v28, 0.0004427343 }
 0x23b   :  { %v262_v26 = vmul.f32 %v355_v11, %v261_v21 }
 0x23c   :  { %v271_v31 = vmul.f32 %v357_v13, %v270_v27 }
 0x246   :  { %v359_v20 = vpop.eup %358 }
 0x247   :  { %v259_v24 = vmul.f32 0.6931472, %v359_v20  ;;  %v361_v25 = vpop.eup %360 }
 0x248   :  { %v268_v30 = vmul.f32 0.6931472, %v361_v25 }
 0x249   :  { %v265_v29 = vsel %vm264_vm4, %v262_v26, %v259_v24 }
 0x24a   :  { %v275_v32 = vsel %vm249_vm5, %v238_v56, %v265_v29  ;;  %v274_v33 = vsel %vm273_vm6, %v271_v31, %v268_v30 }
 0x24b   :  { %v277_v34 = vadd.f32 0.0001, %v275_v32  ;;  %v276_v35 = vsel %vm250_vm7, %v243_v60, %v274_v33 }
 0x24c   :  { %v278_v36 = vadd.f32 0.0001, %v276_v35 }
 0x2a4   :  { %v305_v15 = vpop.permute.xlu1 %304 }
 0x2a5   :  { %v310_v16 = vsel %vm246_vm3, %v305_v15, 0.0 }
 0x2a6   :  { %311 = vadd.xlane.f32.xlu0 %v310_v16 }
 0x2a8   :  { %v307_v17 = vpop.permute.xlu1 %306 }
 0x2a9   :  { %v313_v18 = vsel %vm246_vm3, %v307_v17, 0.0 }
 0x2aa   :  { %314 = vadd.xlane.f32.xlu1 %v313_v18 }
 0x2bc   :  { %281 = vrot.lane.b32.xlu0 %v277_v34, %s368_s5 }
 0x2c0   :  { %283 = vrot.lane.b32.xlu0 %v278_v36, %s368_s5 }
 0x32f   :  { %v312_v37 = vpop.xlane.xlu0 %311 }
 0x330   :  { %362 = vrcp.f32 %v312_v37 }
 0x333   :  { %v315_v38 = vpop.xlane.xlu1 %314  ;;  %v282_v39 = vpop.permute.xlu0 %281 }
 0x334   :  { %364 = vrcp.f32 %v315_v38  ;;  %287 = vst.msk [vmem:[%s581_s6] sm:$0xff] %vm246_vm3, %v282_v39 }
 0x337   :  { %v284_v40 = vpop.permute.xlu0 %283 }
 0x338   :  { %288 = vst.msk [vmem:[%s581_s6 + $0x8] sm:$0xff] %vm246_vm3, %v284_v40 }
 0x33d   :  { %v363_v41 = vpop.eup %362 }
 0x33e   :  { %v318_v42 = vmul.f32 %v363_v41, %v351_v5 }
 0x340   :  { %322 = vrot.lane.b32.xlu0 %v318_v42, %s367_s4 }
 0x341   :  { %v365_v43 = vpop.eup %364 }
 0x342   :  { %v319_v44 = vmul.f32 %v365_v43, %v353_v6 }
 0x344   :  { %324 = vrot.lane.b32.xlu0 %v319_v44, %s367_s4 }
 0x3b2   :  { %v323_v45 = vpop.permute.xlu0 %322 }
 0x3b3   :  { %328 = vst.msk [vmem:[%s582_s7] sm:$0xff] %vm246_vm3, %v323_v45 }
 0x3b6   :  { %v325_v46 = vpop.permute.xlu0 %324 }
 0x3b7   :  { %329 = vst.msk [vmem:[%s582_s7 + $0x8] sm:$0xff] %vm246_vm3, %v325_v46 }

</bundles_post_ra>
